<compile_context>
chip_gen: v7x
topology: tpu7x:2x2x1
jax: 0.10.0
libtpu: 0.0.40
codegen_flags: <defaults>
</compile_context>

<pallas_src>
import functools
import math

import jax
import jax.numpy as jnp
from jax.experimental import pallas as pl
from jax.experimental.pallas import tpu as pltpu

NF = 50          # input features
LATENT = 16      # latent dim
HID = (256, 128, 64)


def _cdiv(a, b):
    return -(-a // b)


def _round_up(v, m):
    return ((v + m - 1) // m) * m


def _default_bf16_epilogue():
    """bf16 elementwise epilogue on v6e/v7x (bf16 VALU); f32 on v5e."""
    try:
        kind = jax.devices()[0].device_kind.lower()
    except Exception:
        return True
    return "v5" not in kind


def encoder_mlp_kernel(x_ref,
                       w1_ref, b1_ref,
                       w2_ref, b2_ref,
                       w3_ref, b3_ref,
                       w4_ref, b4_ref,
                       out_ref, *, bf16_epilogue):
    """One batch tile: x (tb, 50) f32 -> out (tb, 16) f32."""
    x = x_ref[...].astype(jnp.bfloat16)          # cast fused into the kernel

    def layer(h, w_ref, b_ref):
        acc = jnp.dot(h, w_ref[...], preferred_element_type=jnp.float32)
        if bf16_epilogue:
            # v6e/v7x: bf16 VALU -> halves elementwise / VMEM-temp traffic.
            a = acc.astype(jnp.bfloat16) + b_ref[...].astype(jnp.bfloat16)
            return jnp.maximum(a, a * 0.2)
        # v5e: no bf16 VALU; keep the epilogue f32, downcast for the next MXU op.
        a = acc + b_ref[...]
        return jnp.maximum(a, a * 0.2).astype(jnp.bfloat16)

    h1 = layer(x, w1_ref, b1_ref)
    h2 = layer(h1, w2_ref, b2_ref)
    h3 = layer(h2, w3_ref, b3_ref)

    out = jnp.dot(h3, w4_ref[...], preferred_element_type=jnp.float32) + b4_ref[...]
    out_ref[...] = out.astype(out_ref.dtype)     # (tb, 16): minimal HBM writeback


def pack_params(params):
    """Kernel-ready params: (in, out)-layout bf16 weights, (1, out) f32 biases."""
    packed = {}
    for i in range(1, 5):
        packed[f"w{i}"] = params[f"w{i}"].astype(jnp.bfloat16)
        packed[f"b{i}"] = params[f"b{i}"].astype(jnp.float32).reshape(1, -1)
    return packed


@functools.partial(jax.jit, static_argnames=("block_rows", "bf16_epilogue"))
def encoder_forward(x, packed, block_rows=2048, bf16_epilogue=None):
    """x: (B, 50) float32.  packed: pack_params() output.  Returns (B, 16) f32."""
    if bf16_epilogue is None:
        bf16_epilogue = _default_bf16_epilogue()
    B = x.shape[0]

    # Batch tile: multiple of 8, <= block_rows, and >= 2 grid steps whenever B
    # allows it so the "parallel" batch axis can shard over v7x's 2 TensorCores.
    target_steps = max(2, _cdiv(B, block_rows))
    tb = min(block_rows, max(8, _round_up(_cdiv(B, target_steps), 8)))
    steps = _cdiv(B, tb)
    b_pad = steps * tb

    if b_pad != B:
        # Fallback pad pass only when B is not a multiple of tb.
        x_in = jnp.pad(x, ((0, b_pad - B), (0, 0)))
    else:
        x_in = x

    def resident(shape):
        # Constant block index -> stays in VMEM across grid steps (DMA'd once).
        return pl.BlockSpec(shape, lambda i: (0, 0))

    kern = functools.partial(encoder_mlp_kernel, bf16_epilogue=bf16_epilogue)

    out = pl.pallas_call(
        kern,
        out_shape=jax.ShapeDtypeStruct((b_pad, LATENT), jnp.float32),
        grid=(steps,),
        in_specs=[
            pl.BlockSpec((tb, NF), lambda i: (i, 0)),           # x tile (pipelined)
            resident((NF, HID[0])), resident((1, HID[0])),      # layer 1
            resident((HID[0], HID[1])), resident((1, HID[1])),  # layer 2
            resident((HID[1], HID[2])), resident((1, HID[2])),  # layer 3
            resident((HID[2], LATENT)), resident((1, LATENT)),  # layer 4
        ],
        out_specs=pl.BlockSpec((tb, LATENT), lambda i: (i, 0)),
        compiler_params=pltpu.CompilerParams(
            dimension_semantics=("parallel",),
            vmem_limit_bytes=32 * 1024 * 1024,
        ),
    )(x_in,
      packed["w1"], packed["b1"],
      packed["w2"], packed["b2"],
      packed["w3"], packed["b3"],
      packed["w4"], packed["b4"])

    if b_pad != B:
        out = out[:B]
    return out


def init_encoder_params(key, nf=NF, latent_dim=LATENT):
    """PyTorch nn.Linear default init U(-1/sqrt(fan_in), +1/sqrt(fan_in)).
    Weights stored transposed as (in_feat, out_feat); biases as (1, out_feat)."""
    dims = [(nf, HID[0]), (HID[0], HID[1]), (HID[1], HID[2]), (HID[2], latent_dim)]
    params = {}
    keys = jax.random.split(key, 2 * len(dims))
    for i, (fin, fout) in enumerate(dims):
        bound = 1.0 / math.sqrt(fin)
        params[f"w{i+1}"] = jax.random.uniform(keys[2 * i], (fin, fout),
                                               jnp.float32, -bound, bound)
        params[f"b{i+1}"] = jax.random.uniform(keys[2 * i + 1], (1, fout),
                                               jnp.float32, -bound, bound)
    return params


def encoder_ref(x, params):
    """Pure-JAX f32 reference for correctness checking."""
    h = x
    for i in range(1, 4):
        h = h @ params[f"w{i}"] + params[f"b{i}"]
        h = jnp.where(h > 0, h, 0.2 * h)
    return h @ params["w4"] + params["b4"]


if __name__ == "__main__":
    key = jax.random.PRNGKey(0)
    k_x, k_p = jax.random.split(key)

    B = 256                                  # -> tb=128, grid of 2 steps
    x = jax.random.normal(k_x, (B, NF), dtype=jnp.float32)
    params = init_encoder_params(k_p)
    packed = pack_params(params)

    out = jax.block_until_ready(encoder_forward(x, packed))
    ref = encoder_ref(x, params)

    assert out.shape == (B, LATENT), out.shape
    max_err = float(jnp.max(jnp.abs(out - ref)))
    # bf16 matmul operands / activations (f32 accumulation) vs f32 reference.
    assert jnp.allclose(out, ref, atol=5e-2, rtol=5e-2), max_err

    print("KERNEL_OK")
</pallas_src>

<mosaic_0001>
module attributes {stable_mosaic.version = 11 : i64} {
  func.func @encoder_mlp_kernel(%arg0: i32, %arg1: memref<128x50xf32, #tpu.memory_space<vmem>>, %arg2: memref<50x256xbf16, #tpu.memory_space<vmem>>, %arg3: memref<1x256xf32, #tpu.memory_space<vmem>>, %arg4: memref<256x128xbf16, #tpu.memory_space<vmem>>, %arg5: memref<1x128xf32, #tpu.memory_space<vmem>>, %arg6: memref<128x64xbf16, #tpu.memory_space<vmem>>, %arg7: memref<1x64xf32, #tpu.memory_space<vmem>>, %arg8: memref<64x16xbf16, #tpu.memory_space<vmem>>, %arg9: memref<1x16xf32, #tpu.memory_space<vmem>>, %arg10: memref<128x16xf32, #tpu.memory_space<vmem>>) attributes {dimension_semantics = [#tpu.dimension_semantics<parallel>], iteration_bounds = array<i64: 2>, scalar_prefetch = 0 : i64, scratch_operands = 0 : i64, tpu.core_type = #tpu.core_type<tc>, window_params = [{transform_indices = @transform_0, window_bounds = array<i64: 128, 50>}, {pipeline_mode = #tpu.pipeline_mode<synchronous>, transform_indices = @transform_1, window_bounds = array<i64: 50, 256>}, {pipeline_mode = #tpu.pipeline_mode<synchronous>, transform_indices = @transform_2, window_bounds = array<i64: 1, 256>}, {pipeline_mode = #tpu.pipeline_mode<synchronous>, transform_indices = @transform_3, window_bounds = array<i64: 256, 128>}, {pipeline_mode = #tpu.pipeline_mode<synchronous>, transform_indices = @transform_4, window_bounds = array<i64: 1, 128>}, {pipeline_mode = #tpu.pipeline_mode<synchronous>, transform_indices = @transform_5, window_bounds = array<i64: 128, 64>}, {pipeline_mode = #tpu.pipeline_mode<synchronous>, transform_indices = @transform_6, window_bounds = array<i64: 1, 64>}, {pipeline_mode = #tpu.pipeline_mode<synchronous>, transform_indices = @transform_7, window_bounds = array<i64: 64, 16>}, {pipeline_mode = #tpu.pipeline_mode<synchronous>, transform_indices = @transform_8, window_bounds = array<i64: 1, 16>}, {transform_indices = @transform_9, window_bounds = array<i64: 128, 16>}]} {
    %c0 = arith.constant 0 : index
    %c0_0 = arith.constant 0 : index
    %0 = vector.load %arg1[%c0, %c0_0] : memref<128x50xf32, #tpu.memory_space<vmem>>, vector<128x50xf32>
    %1 = arith.truncf %0 : vector<128x50xf32> to vector<128x50xbf16>
    %c0_1 = arith.constant 0 : index
    %c0_2 = arith.constant 0 : index
    %2 = vector.load %arg2[%c0_1, %c0_2] : memref<50x256xbf16, #tpu.memory_space<vmem>>, vector<50x256xbf16>
    %cst = arith.constant dense<0.000000e+00> : vector<128x256xf32>
    %3 = tpu.matmul %1, %2, %cst {dimension_numbers = #tpu.dot_dimension_numbers<[1], [0], [0], [1], [0, 0, 1, 1], [], []>} : vector<128x50xbf16>, vector<50x256xbf16>, vector<128x256xf32> -> vector<128x256xf32>
    %4 = arith.truncf %3 : vector<128x256xf32> to vector<128x256xbf16>
    %c0_3 = arith.constant 0 : index
    %c0_4 = arith.constant 0 : index
    %5 = vector.load %arg3[%c0_3, %c0_4] : memref<1x256xf32, #tpu.memory_space<vmem>>, vector<1x256xf32>
    %6 = arith.truncf %5 : vector<1x256xf32> to vector<1x256xbf16>
    %7 = vector.broadcast %6 : vector<1x256xbf16> to vector<128x256xbf16>
    %8 = arith.addf %4, %7 : vector<128x256xbf16>
    %cst_5 = arith.constant 2.001950e-01 : bf16
    %9 = vector.broadcast %cst_5 : bf16 to vector<128x256xbf16>
    %10 = arith.mulf %8, %9 : vector<128x256xbf16>
    %11 = arith.maximumf %8, %10 : vector<128x256xbf16>
    %c0_6 = arith.constant 0 : index
    %c0_7 = arith.constant 0 : index
    %12 = vector.load %arg4[%c0_6, %c0_7] : memref<256x128xbf16, #tpu.memory_space<vmem>>, vector<256x128xbf16>
    %cst_8 = arith.constant dense<0.000000e+00> : vector<128x128xf32>
    %13 = tpu.matmul %11, %12, %cst_8 {dimension_numbers = #tpu.dot_dimension_numbers<[1], [0], [0], [1], [0, 0, 1, 1], [], []>} : vector<128x256xbf16>, vector<256x128xbf16>, vector<128x128xf32> -> vector<128x128xf32>
    %14 = arith.truncf %13 : vector<128x128xf32> to vector<128x128xbf16>
    %c0_9 = arith.constant 0 : index
    %c0_10 = arith.constant 0 : index
    %15 = vector.load %arg5[%c0_9, %c0_10] : memref<1x128xf32, #tpu.memory_space<vmem>>, vector<1x128xf32>
    %16 = arith.truncf %15 : vector<1x128xf32> to vector<1x128xbf16>
    %17 = vector.broadcast %16 : vector<1x128xbf16> to vector<128x128xbf16>
    %18 = arith.addf %14, %17 : vector<128x128xbf16>
    %cst_11 = arith.constant 2.001950e-01 : bf16
    %19 = vector.broadcast %cst_11 : bf16 to vector<128x128xbf16>
    %20 = arith.mulf %18, %19 : vector<128x128xbf16>
    %21 = arith.maximumf %18, %20 : vector<128x128xbf16>
    %c0_12 = arith.constant 0 : index
    %c0_13 = arith.constant 0 : index
    %22 = vector.load %arg6[%c0_12, %c0_13] : memref<128x64xbf16, #tpu.memory_space<vmem>>, vector<128x64xbf16>
    %cst_14 = arith.constant dense<0.000000e+00> : vector<128x64xf32>
    %23 = tpu.matmul %21, %22, %cst_14 {dimension_numbers = #tpu.dot_dimension_numbers<[1], [0], [0], [1], [0, 0, 1, 1], [], []>} : vector<128x128xbf16>, vector<128x64xbf16>, vector<128x64xf32> -> vector<128x64xf32>
    %24 = arith.truncf %23 : vector<128x64xf32> to vector<128x64xbf16>
    %c0_15 = arith.constant 0 : index
    %c0_16 = arith.constant 0 : index
    %25 = vector.load %arg7[%c0_15, %c0_16] : memref<1x64xf32, #tpu.memory_space<vmem>>, vector<1x64xf32>
    %26 = arith.truncf %25 : vector<1x64xf32> to vector<1x64xbf16>
    %27 = vector.broadcast %26 : vector<1x64xbf16> to vector<128x64xbf16>
    %28 = arith.addf %24, %27 : vector<128x64xbf16>
    %cst_17 = arith.constant 2.001950e-01 : bf16
    %29 = vector.broadcast %cst_17 : bf16 to vector<128x64xbf16>
    %30 = arith.mulf %28, %29 : vector<128x64xbf16>
    %31 = arith.maximumf %28, %30 : vector<128x64xbf16>
    %c0_18 = arith.constant 0 : index
    %c0_19 = arith.constant 0 : index
    %32 = vector.load %arg8[%c0_18, %c0_19] : memref<64x16xbf16, #tpu.memory_space<vmem>>, vector<64x16xbf16>
    %cst_20 = arith.constant dense<0.000000e+00> : vector<128x16xf32>
    %33 = tpu.matmul %31, %32, %cst_20 {dimension_numbers = #tpu.dot_dimension_numbers<[1], [0], [0], [1], [0, 0, 1, 1], [], []>} : vector<128x64xbf16>, vector<64x16xbf16>, vector<128x16xf32> -> vector<128x16xf32>
    %c0_21 = arith.constant 0 : index
    %c0_22 = arith.constant 0 : index
    %34 = vector.load %arg9[%c0_21, %c0_22] : memref<1x16xf32, #tpu.memory_space<vmem>>, vector<1x16xf32>
    %35 = vector.broadcast %34 : vector<1x16xf32> to vector<128x16xf32>
    %36 = arith.addf %33, %35 : vector<128x16xf32>
    %c0_23 = arith.constant 0 : index
    %c0_24 = arith.constant 0 : index
    %37 = vector.load %arg10[%c0_23, %c0_24] : memref<128x16xf32, #tpu.memory_space<vmem>>, vector<128x16xf32>
    tpu.vector_store %arg10[%c0_23, %c0_24], %36 {strides = array<i32>} : memref<128x16xf32, #tpu.memory_space<vmem>>, vector<128x16xf32>,
    return
  }
  func.func @transform_0(%arg0: i32) -> (i32, i32) {
    %c0_i32 = arith.constant 0 : i32
    %c0_i32_0 = arith.constant 0 : i32
    return %arg0, %c0_i32 : i32, i32
  }
  func.func @transform_1(%arg0: i32) -> (i32, i32) {
    %c0_i32 = arith.constant 0 : i32
    %c0_i32_0 = arith.constant 0 : i32
    %c0_i32_1 = arith.constant 0 : i32
    return %c0_i32, %c0_i32_0 : i32, i32
  }
  func.func @transform_2(%arg0: i32) -> (i32, i32) {
    %c0_i32 = arith.constant 0 : i32
    %c0_i32_0 = arith.constant 0 : i32
    %c0_i32_1 = arith.constant 0 : i32
    return %c0_i32, %c0_i32_0 : i32, i32
  }
  func.func @transform_3(%arg0: i32) -> (i32, i32) {
    %c0_i32 = arith.constant 0 : i32
    %c0_i32_0 = arith.constant 0 : i32
    %c0_i32_1 = arith.constant 0 : i32
    return %c0_i32, %c0_i32_0 : i32, i32
  }
  func.func @transform_4(%arg0: i32) -> (i32, i32) {
    %c0_i32 = arith.constant 0 : i32
    %c0_i32_0 = arith.constant 0 : i32
    %c0_i32_1 = arith.constant 0 : i32
    return %c0_i32, %c0_i32_0 : i32, i32
  }
  func.func @transform_5(%arg0: i32) -> (i32, i32) {
    %c0_i32 = arith.constant 0 : i32
    %c0_i32_0 = arith.constant 0 : i32
    %c0_i32_1 = arith.constant 0 : i32
    return %c0_i32, %c0_i32_0 : i32, i32
  }
  func.func @transform_6(%arg0: i32) -> (i32, i32) {
    %c0_i32 = arith.constant 0 : i32
    %c0_i32_0 = arith.constant 0 : i32
    %c0_i32_1 = arith.constant 0 : i32
    return %c0_i32, %c0_i32_0 : i32, i32
  }
  func.func @transform_7(%arg0: i32) -> (i32, i32) {
    %c0_i32 = arith.constant 0 : i32
    %c0_i32_0 = arith.constant 0 : i32
    %c0_i32_1 = arith.constant 0 : i32
    return %c0_i32, %c0_i32_0 : i32, i32
  }
  func.func @transform_8(%arg0: i32) -> (i32, i32) {
    %c0_i32 = arith.constant 0 : i32
    %c0_i32_0 = arith.constant 0 : i32
    %c0_i32_1 = arith.constant 0 : i32
    return %c0_i32, %c0_i32_0 : i32, i32
  }
  func.func @transform_9(%arg0: i32) -> (i32, i32) {
    %c0_i32 = arith.constant 0 : i32
    %c0_i32_0 = arith.constant 0 : i32
    return %arg0, %c0_i32 : i32, i32
  }
}

</mosaic_0001>

<bundles_post_ra>
// kernel: encoder_forward.1
= control target key start
LH: loop header
LB: loop body
LE: loop exit
PB: predicated region body
PF: predicated region fallthrough
CT: control target
= control target key end

     0   :  { %s1671_s30 = smov 0   ;;  %s1925_s0 = inlined_call_operand.vmem [shape: f32[256,50], index: 0, kind: input, shape index: {}]   ;;  %s1926_s1 = inlined_call_operand.vmem [shape: bf16[50,256], index: 1, kind: input, shape index: {}]   ;;  %s1927_s2 = inlined_call_operand.vmem [shape: f32[1,256], index: 2, kind: input, shape index: {}]   ;;  %s1928_s3 = inlined_call_operand.vmem [shape: bf16[256,128], index: 3, kind: input, shape index: {}]   ;;  %s1929_s4 = inlined_call_operand.vmem [shape: f32[1,128], index: 4, kind: input, shape index: {}]   ;;  %s1930_s5 = inlined_call_operand.vmem [shape: bf16[128,64], index: 5, kind: input, shape index: {}]   ;;  %s1931_s6 = inlined_call_operand.vmem [shape: f32[1,64], index: 6, kind: input, shape index: {}]   ;;  %s1932_s7 = inlined_call_operand.vmem [shape: bf16[64,16], index: 7, kind: input, shape index: {}]   ;;  %s1933_s8 = inlined_call_operand.vmem [shape: f32[1,16], index: 8, kind: input, shape index: {}]   ;;  %s1934_s9 = inlined_call_operand.vmem [shape: f32[256,16], index: 9, kind: output, shape index: {}]  }
   0x1 LB: > { %s1343_s10 = sadd.s32 4294967295, %s1618_s30   ;;  %p1347_p0 = scmp.ge.s32.totalorder %s1618_s30, 1  ;;  %s1618_s30 = sphi %s1671_s30, %s19_s30  }
   0x2   : > { %p288_p1 = scmp.lt.s32.totalorder %s1618_s30, 3 }
   0x4   : > { %p289_p2 = pnand %p1347_p0, %p288_p1 }
   0x5   : > { %v1573_v0 = vld [vmem:[%s1926_s1 + $0x4] ss:$8 sps:$4 sm:$0xff] (!%p289_p2)   ;;  %v1575_v1 = vld [vmem:[%s1926_s1] ss:$8 sps:$4 sm:$0xff] (!%p289_p2)   ;;  %v1620_v2 = vmov (!%p289_p2), 0   ;;  %s1348_s15 = sshll.u32 (!%p289_p2), %s1343_s10, 4  ;;  %v567_v54 = vlaneseq (!%p289_p2) }
   0x6   : > { %292 = sbr.rel (%p289_p2) target bundleno = 969 (0x3c9), region = 56  ;;  %468 = vmatprep.mubr.bf16.mxu0 (!%p289_p2), %v1620_v2  ;;  %436 = vmatprep.subr.bf16.mxu0 (!%p289_p2), %v1573_v0  ;;  %v1576_v3 = vld [vmem:[%s1926_s1 + $0x14] ss:$8 sps:$4 sm:$0xff] (!%p289_p2)   ;;  %p325_p3 = scmp.lt.s32.totalorder (!%p289_p2), %s1348_s15, 31  ;;  %v1578_v4 = vld [vmem:[%s1926_s1 + $0x10] ss:$8 sps:$4 sm:$0xff] (!%p289_p2)  }
   0x7   : > { %437 = vmatpush1.bf16.msra.mxu0 (!%p289_p2), %v1575_v1  ;;  %v1579_v5 = vld [vmem:[%s1926_s1 + $0x24] ss:$8 sps:$4 sm:$0xff] (!%p289_p2)   ;;  %v368_v6 = vld [vmem:[%s1926_s1 + $0x30] sm:$0x11] (!%p289_p2)  ;;  %v1581_v8 = vld [vmem:[%s1926_s1 + $0x20] ss:$8 sps:$4 sm:$0xff] (!%p289_p2)  }
   0x8   : > { %438 = vmatprep.subr.bf16.mxu0 (!%p289_p2), %v1576_v3  ;;  %v1584_v7 = vld [vmem:[%s1928_s3 + $0x40] sm:$0xff] (!%p289_p2)   ;;  %v1586_v10 = vld [vmem:[%s1928_s3 + $0x48] sm:$0xff] (!%p289_p2)   ;;  %v1359_v11 = vcombine.high (!%p289_p2), %v368_v6, %v368_v6  ;;  %v1358_v12 = vcombine.low (!%p289_p2), %v368_v6, %v368_v6  ;;  %vm429_vm0 = vcmask (!%p289_p2), 1040384   ;;  %v1588_v18 = vld [vmem:[%s1928_s3 + $0x50] sm:$0xff] (!%p289_p2)   ;;  %vm404_vm1 = vcmask (!%p289_p2), 408576  }
   0x9   : > { %1408 = vmatprep.subr.bf16.mxu1 (!%p289_p2), %v1584_v7  ;;  %v1585_v9 = vld [vmem:[%s1928_s3] sm:$0xff] (!%p289_p2)   ;;  %v1587_v16 = vld [vmem:[%s1928_s3 + $0x8] sm:$0xff] (!%p289_p2)   ;;  %v1589_v19 = vld [vmem:[%s1928_s3 + $0x10] sm:$0xff] (!%p289_p2)   ;;  %v568_v55 = vshrl.u32 (!%p289_p2), %v567_v54, 7  ;;  %vm1148_vm2 = vcmask (!%p289_p2), 523264   ;;  %vm1270_vm3 = vcmask (!%p289_p2), 130048  }
   0xa   : > { %1409 = vmatpush3.bf16.msra.mxu1 (!%p289_p2), %v1585_v9  ;;  %v431_v15 = vsel (!%p289_p2), %vm429_vm0, %v1358_v12, 0  ;;  %v1590_v20 = vld [vmem:[%s1928_s3 + $0x58] sm:$0xff] (!%p289_p2)   ;;  %v1592_v24 = vld [vmem:[%s1928_s3 + $0x60] sm:$0xff] (!%p289_p2)   ;;  %v1594_v45 = vld [vmem:[%s1928_s3 + $0x68] sm:$0xff] (!%p289_p2)  }
   0xb   : > { %439 = vmatpush1.bf16.msra.mxu0 (!%p289_p2), %v1578_v4  ;;  %1410 = vmatprep.subr.bf16.mxu1 (!%p289_p2), %v1586_v10  ;;  %v1591_v23 = vld [vmem:[%s1928_s3 + $0x18] sm:$0xff] (!%p289_p2)   ;;  %v1593_v25 = vld [vmem:[%s1928_s3 + $0x20] sm:$0xff] (!%p289_p2)   ;;  %v1595_v46 = vld [vmem:[%s1928_s3 + $0x28] sm:$0xff] (!%p289_p2)   ;;  %v1799_v56 = vsub.s32 (!%p289_p2), 0, %v568_v55  ;;  %v573_v58 = vsub.s32 (!%p289_p2), 1, %v568_v55 }
   0xc   : > { %440 = vmatprep.subr.bf16.mxu0 (!%p289_p2), %v1579_v5  ;;  %v1596_v47 = vld [vmem:[%s1928_s3 + $0x70] sm:$0xff] (!%p289_p2)   ;;  %v1598_v49 = vld [vmem:[%s1928_s3 + $0x78] sm:$0xff] (!%p289_p2)   ;;  %v1600_v51 = vld [vmem:[%s1930_s5] sm:$0xff] (!%p289_p2)  }
   0xd   : > { %s1936_s15 = smov (!%p325_p3, %s1348_s15), 31  ;;  %v1597_v48 = vld [vmem:[%s1928_s3 + $0x30] sm:$0xff]   ;;  %v1599_v50 = vld [vmem:[%s1928_s3 + $0x38] sm:$0xff]   ;;  %v1601_v52 = vld [vmem:[%s1930_s5 + $0x8] sm:$0xff]  }
   0xe   : > { %s1349_s28 = sshll.u32 %s1936_s15, 3  ;;  %1411 = vmatpush3.bf16.msra.mxu1 %v1587_v16  ;;  %v1602_v53 = vld [vmem:[%s1930_s5 + $0x10] sm:$0xff]   ;;  %v565_v57 = vld [vmem:[%s1927_s2] sm:$0x3] }
   0xf   : > { %s1718_s16 = scalar_lea.vmem %s1925_s0, %s1349_s28  ;;  %441 = vmatpush1.bf16.msra.mxu0 %v1581_v8  ;;  %1412 = vmatprep.subr.bf16.mxu1 %v1588_v18  ;;  %v570_v59 = vrot.slane %v565_v57, %v1799_v56  ;;  %v574_v60 = vrot.slane %v565_v57, %v573_v58  ;;  %s1888_s23 = scalar_lea.vmem %s1934_s9, %s1349_s28 }
  0x10   : > { %v338_v13 = vld [vmem:[%s1718_s16] sm:$0xff]  ;;  %v339_v14 = vld [vmem:[%s1718_s16 + $0x8] sm:$0xff]  ;;  %1360 = vmatprep.subr.msk.bf16.mxu0 %vm429_vm0, %v1359_v11  ;;  %v340_v21 = vld [vmem:[%s1718_s16 + $0x10] sm:$0xff] }
  0x11   : > { %v354_v17 = vpack.c.bf16 %v339_v14, %v338_v13  ;;  %v341_v22 = vld [vmem:[%s1718_s16 + $0x18] sm:$0xff]  ;;  %v342_v27 = vld [vmem:[%s1718_s16 + $0x20] sm:$0xff]  ;;  %v343_v28 = vld [vmem:[%s1718_s16 + $0x28] sm:$0xff]  ;;  %v577_v61 = vpack.c.bf16 %v570_v59, %v570_v59  ;;  %v578_v62 = vpack.c.bf16 %v574_v60, %v574_v60 }
  0x12   : > { %1413 = vmatpush3.bf16.msra.mxu1 %v1589_v19  ;;  %v355_v26 = vpack.c.bf16 %v341_v22, %v340_v21  ;;  %v356_v29 = vpack.c.bf16 %v343_v28, %v342_v27  ;;  %v344_v30 = vld [vmem:[%s1718_s16 + $0x30] sm:$0xff]  ;;  %v345_v31 = vld [vmem:[%s1718_s16 + $0x38] sm:$0xff]  ;;  %v346_v33 = vld [vmem:[%s1718_s16 + $0x40] sm:$0xff] }
  0x13   : > { %443 = vmatpush1.bf16.msra.mxu0 %v431_v15  ;;  %1414 = vmatprep.subr.bf16.mxu1 %v1590_v20  ;;  %v357_v32 = vpack.c.bf16 %v345_v31, %v344_v30  ;;  %v347_v34 = vld [vmem:[%s1718_s16 + $0x48] sm:$0xff]  ;;  %v348_v36 = vld [vmem:[%s1718_s16 + $0x50] sm:$0xff]  ;;  %v349_v37 = vld [vmem:[%s1718_s16 + $0x58] sm:$0xff]  ;;  %v580_v63 = vpack.i.b16 %v577_v61, %v577_v61  ;;  %v587_v0 = vpack.i.b16 %v578_v62, %v578_v62 }
  0x14   : > { %v358_v35 = vpack.c.bf16 %v347_v34, %v346_v33  ;;  %v359_v38 = vpack.c.bf16 %v349_v37, %v348_v36  ;;  %v350_v39 = vld [vmem:[%s1718_s16 + $0x60] sm:$0xff]  ;;  %v351_v40 = vld [vmem:[%s1718_s16 + $0x68] sm:$0xff]  ;;  %v352_v42 = vld [vmem:[%s1718_s16 + $0x70] sm:$0xff]  ;;  %1500 = vmatprep.subr.bf16.mxu0 %v1600_v51 }
  0x15   : > { %v360_v41 = vpack.c.bf16 %v351_v40, %v350_v39  ;;  %v353_v43 = vld [vmem:[%s1718_s16 + $0x78] sm:$0xff]  ;;  %v1806_v3 = vrot.slane %v580_v63, %v1799_v56  ;;  %v1809_v5 = vrot.slane %v587_v0, %v1799_v56 }
  0x16   : > { %1361 = vmatmul.mubr.msk.bf16.vlgmr.msra.gmra.mrb[0].mxu0 %vm404_vm1, %v354_v17  ;;  %1415 = vmatpush3.bf16.msra.mxu1 %v1591_v23  ;;  %v361_v44 = vpack.c.bf16 %v353_v43, %v352_v42 }
  0x17   : > { %478 = vmatprep.mubr.bf16.mxu0 %v1620_v2  ;;  %1416 = vmatprep.subr.bf16.mxu1 %v1592_v24 }
  0x18   : > { %1501 = vmatpush3.bf16.msra.mxu0 %v1600_v51 }
  0x19   : > { %1502 = vmatprep.subr.bf16.mxu0 %v1601_v52 }
  0x1a   : > { %1417 = vmatpush3.bf16.msra.mxu1 %v1593_v25 }
  0x1b   : > { %1418 = vmatprep.subr.bf16.mxu1 %v1594_v45 }
  0x1c   : > { %1503 = vmatpush3.bf16.msra.mxu0 %v1601_v52 }
  0x1d   : > { %1504 = vmatprep.subr.bf16.mxu0 %v1602_v53 }
  0x1e   : > { %1362 = vmatmul.mubr.msk.bf16.gmra.mrb[4].mxu0 %vm404_vm1, %v355_v26  ;;  %1419 = vmatpush3.bf16.msra.mxu1 %v1595_v46 }
  0x1f   : > { %488 = vmatprep.mubr.bf16.mxu0 %v1620_v2  ;;  %1420 = vmatprep.subr.bf16.mxu1 %v1596_v47 }
  0x20   : > { %1505 = vmatpush3.bf16.msra.mxu0 %v1602_v53 }
  0x22   : > { %1421 = vmatpush3.bf16.msra.mxu1 %v1597_v48 }
  0x23   : > { %1422 = vmatprep.subr.bf16.mxu1 %v1598_v49 }
  0x26   : > { %1363 = vmatmul.mubr.msk.bf16.gmra.mrb[8].mxu0 %vm404_vm1, %v356_v29  ;;  %1423 = vmatpush3.bf16.msra.mxu1 %v1599_v50 }
  0x27   : > { %498 = vmatprep.mubr.bf16.mxu0 %v1620_v2 }
  0x2e   : > { %1364 = vmatmul.mubr.msk.bf16.gmra.mrb[12].mxu0 %vm404_vm1, %v357_v32 }
  0x2f   : > { %508 = vmatprep.mubr.bf16.mxu0 %v1620_v2 }
  0x36   : > { %1365 = vmatmul.mubr.msk.bf16.gmra.mrb[16].mxu0 %vm404_vm1, %v358_v35 }
  0x37   : > { %518 = vmatprep.mubr.bf16.mxu0 %v1620_v2 }
  0x3e   : > { %1366 = vmatmul.mubr.msk.bf16.gmra.mrb[20].mxu0 %vm404_vm1, %v359_v38 }
  0x3f   : > { %528 = vmatprep.mubr.bf16.mxu0 %v1620_v2 }
  0x46   : > { %1367 = vmatmul.mubr.msk.bf16.gmra.mrb[24].mxu0 %vm404_vm1, %v360_v41 }
  0x47   : > { %538 = vmatprep.mubr.bf16.mxu0 %v1620_v2 }
  0x4e   : > { %1368 = vmatmul.mubr.msk.bf16.gmra.mrb[28].mxu0 %vm404_vm1, %v361_v44 }
  0xe9   : > { %v470_v1 = vpop.f32.mrb[0].mxu0 }
  0xea   : > { %v472_v2 = vpop.f32.mrb[1].mxu0 }
  0xeb   : > { %v474_v4 = vpop.f32.mrb[2].mxu0 }
  0xec   : > { %v549_v6 = vpack.c.bf16 %v474_v4, %v470_v1  ;;  %v476_v7 = vpop.f32.mrb[3].mxu0 }
  0xed   : > { %v550_v8 = vpack.c.bf16 %v476_v7, %v472_v2 }
  0xee   : > { %v593_v9 = vadd.bf16 %v1806_v3, %v549_v6 }
  0xef   : > { %v594_v10 = vadd.bf16 %v1809_v5, %v550_v8 }
  0xf0   : > { %v609_v11 = vmul.bf16 1045249613, %v593_v9 }
  0xf1   : > { %v480_v12 = vpop.f32.mrb[4].mxu0  ;;  %v610_v13 = vmul.bf16 1045249613, %v594_v10 }
  0xf2   : > { %v482_v14 = vpop.f32.mrb[5].mxu0  ;;  %v625_v19 = vmax.bf16 %v609_v11, %v593_v9 }
  0xf3   : > { %v484_v15 = vpop.f32.mrb[6].mxu0  ;;  %v626_v16 = vmax.bf16 %v610_v13, %v594_v10 }
  0xf4   : > { %v551_v17 = vpack.c.bf16 %v484_v15, %v480_v12  ;;  %v486_v18 = vpop.f32.mrb[7].mxu0 }
  0xf5   : > { %v552_v20 = vpack.c.bf16 %v486_v18, %v482_v14  ;;  %801 = vmatprep.mubr.bf16.mxu1 %v626_v16 }
  0xf6   : > { %v595_v21 = vadd.bf16 %v1806_v3, %v551_v17  ;;  %802 = vmatmul.mubr.bf16.vlgmr.msra.gmra.mrb[0].mxu1 %v625_v19 }
  0xf7   : > { %v596_v22 = vadd.bf16 %v1809_v5, %v552_v20 }
  0xf8   : > { %v611_v23 = vmul.bf16 1045249613, %v595_v21 }
  0xf9   : > { %v612_v24 = vmul.bf16 1045249613, %v596_v22  ;;  %v490_v25 = vpop.f32.mrb[8].mxu0 }
  0xfa   : > { %v492_v26 = vpop.f32.mrb[9].mxu0  ;;  %v627_v31 = vmax.bf16 %v611_v23, %v595_v21 }
  0xfb   : > { %v494_v27 = vpop.f32.mrb[10].mxu0  ;;  %v628_v28 = vmax.bf16 %v612_v24, %v596_v22 }
  0xfc   : > { %v553_v29 = vpack.c.bf16 %v494_v27, %v490_v25  ;;  %v496_v30 = vpop.f32.mrb[11].mxu0 }
  0xfd   : > { %v554_v32 = vpack.c.bf16 %v496_v30, %v492_v26  ;;  %809 = vmatprep.mubr.bf16.mxu1 %v628_v28 }
  0xfe   : > { %v597_v33 = vadd.bf16 %v1806_v3, %v553_v29  ;;  %810 = vmatmul.mubr.bf16.gmra.mrb[4].mxu1 %v627_v31 }
  0xff   : > { %v598_v34 = vadd.bf16 %v1809_v5, %v554_v32 }
 0x100   : > { %v613_v35 = vmul.bf16 1045249613, %v597_v33 }
 0x101   : > { %v614_v36 = vmul.bf16 1045249613, %v598_v34  ;;  %v500_v37 = vpop.f32.mrb[12].mxu0 }
 0x102   : > { %v502_v38 = vpop.f32.mrb[13].mxu0  ;;  %v629_v43 = vmax.bf16 %v613_v35, %v597_v33 }
 0x103   : > { %v504_v39 = vpop.f32.mrb[14].mxu0  ;;  %v630_v40 = vmax.bf16 %v614_v36, %v598_v34 }
 0x104   : > { %v555_v41 = vpack.c.bf16 %v504_v39, %v500_v37  ;;  %v506_v42 = vpop.f32.mrb[15].mxu0  ;;  %v1604_v39 = vld [vmem:[%s1930_s5 + $0x20] sm:$0xff]  }
 0x105   : > { %v556_v44 = vpack.c.bf16 %v506_v42, %v502_v38  ;;  %817 = vmatprep.mubr.bf16.mxu1 %v630_v40  ;;  %v1603_v38 = vld [vmem:[%s1930_s5 + $0x18] sm:$0xff]   ;;  %v1609_v42 = vld [vmem:[%s1932_s7 + $0x8] sm:$0xff]  }
 0x106   : > { %v599_v45 = vadd.bf16 %v1806_v3, %v555_v41  ;;  %818 = vmatmul.mubr.bf16.gmra.mrb[8].mxu1 %v629_v43  ;;  %1506 = vmatprep.subr.bf16.mxu0 %v1603_v38  ;;  %v1607_v40 = vld [vmem:[%s1930_s5 + $0x38] sm:$0xff]   ;;  %v1608_v41 = vld [vmem:[%s1932_s7] sm:$0xff]  }
 0x107   : > { %v600_v46 = vadd.bf16 %v1809_v5, %v556_v44  ;;  %1507 = vmatpush3.bf16.msra.mxu0 %v1603_v38  ;;  %1556 = vmatprep.subr.bf16.mxu1 %v1608_v41  ;;  %v874_v43 = vld [vmem:[%s1929_s4] sm:$0x1] }
 0x108   : > { %v615_v47 = vmul.bf16 1045249613, %v599_v45  ;;  %1508 = vmatprep.subr.bf16.mxu0 %v1604_v39  ;;  %1560 = vmatpush3.bf16.msra.mxu1 %v1608_v41  ;;  %v875_v44 = vpack.c.bf16 %v874_v43, %v874_v43 }
 0x109   : > { %v616_v48 = vmul.bf16 1045249613, %v600_v46  ;;  %v510_v49 = vpop.f32.mrb[16].mxu0  ;;  %1557 = vmatprep.subr.bf16.mxu1 %v1609_v42 }
 0x10a   : > { %v512_v50 = vpop.f32.mrb[17].mxu0  ;;  %v631_v55 = vmax.bf16 %v615_v47, %v599_v45 }
 0x10b   : > { %v514_v51 = vpop.f32.mrb[18].mxu0  ;;  %v632_v52 = vmax.bf16 %v616_v48, %v600_v46  ;;  %1509 = vmatpush3.bf16.msra.mxu0 %v1604_v39  ;;  %v877_v46 = vpack.i.b16 %v875_v44, %v875_v44 }
 0x10c   : > { %v557_v53 = vpack.c.bf16 %v514_v51, %v510_v49  ;;  %v516_v54 = vpop.f32.mrb[19].mxu0  ;;  %1561 = vmatpush3.bf16.msra.mxu1 %v1609_v42 }
 0x10d   : > { %v558_v57 = vpack.c.bf16 %v516_v54, %v512_v50  ;;  %825 = vmatprep.mubr.bf16.mxu1 %v632_v52  ;;  %v1852_v52 = vrot.slane %v877_v46, %v1799_v56 }
 0x10e   : > { %v601_v58 = vadd.bf16 %v1806_v3, %v557_v53  ;;  %826 = vmatmul.mubr.bf16.gmra.mrb[12].mxu1 %v631_v55 }
 0x10f   : > { %v602_v59 = vadd.bf16 %v1809_v5, %v558_v57 }
 0x110   : > { %v617_v60 = vmul.bf16 1045249613, %v601_v58 }
 0x111   : > { %v618_v61 = vmul.bf16 1045249613, %v602_v59  ;;  %v520_v62 = vpop.f32.mrb[20].mxu0 }
 0x112   : > { %v522_v63 = vpop.f32.mrb[21].mxu0  ;;  %v633_v6 = vmax.bf16 %v617_v60, %v601_v58 }
 0x113   : > { %v524_v0 = vpop.f32.mrb[22].mxu0  ;;  %v634_v1 = vmax.bf16 %v618_v61, %v602_v59 }
 0x114   : > { %v559_v2 = vpack.c.bf16 %v524_v0, %v520_v62  ;;  %v526_v4 = vpop.f32.mrb[23].mxu0 }
 0x115   : > { %v560_v7 = vpack.c.bf16 %v526_v4, %v522_v63  ;;  %833 = vmatprep.mubr.bf16.mxu1 %v634_v1 }
 0x116   : > { %v603_v8 = vadd.bf16 %v1806_v3, %v559_v2  ;;  %834 = vmatmul.mubr.bf16.gmra.mrb[16].mxu1 %v633_v6 }
 0x117   : > { %v604_v9 = vadd.bf16 %v1809_v5, %v560_v7 }
 0x118   : > { %v619_v10 = vmul.bf16 1045249613, %v603_v8 }
 0x119   : > { %v620_v11 = vmul.bf16 1045249613, %v604_v9  ;;  %v530_v12 = vpop.f32.mrb[24].mxu0 }
 0x11a   : > { %v532_v13 = vpop.f32.mrb[25].mxu0  ;;  %v635_v18 = vmax.bf16 %v619_v10, %v603_v8 }
 0x11b   : > { %v534_v14 = vpop.f32.mrb[26].mxu0  ;;  %v636_v15 = vmax.bf16 %v620_v11, %v604_v9 }
 0x11c   : > { %v561_v16 = vpack.c.bf16 %v534_v14, %v530_v12  ;;  %v536_v17 = vpop.f32.mrb[27].mxu0 }
 0x11d   : > { %v562_v19 = vpack.c.bf16 %v536_v17, %v532_v13  ;;  %841 = vmatprep.mubr.bf16.mxu1 %v636_v15 }
 0x11e   : > { %v605_v20 = vadd.bf16 %v1806_v3, %v561_v16  ;;  %842 = vmatmul.mubr.bf16.gmra.mrb[20].mxu1 %v635_v18 }
 0x11f   : > { %v606_v21 = vadd.bf16 %v1809_v5, %v562_v19 }
 0x120   : > { %v621_v22 = vmul.bf16 1045249613, %v605_v20 }
 0x121   : > { %v622_v23 = vmul.bf16 1045249613, %v606_v21  ;;  %v540_v24 = vpop.f32.mrb[28].mxu0 }
 0x122   : > { %v542_v25 = vpop.f32.mrb[29].mxu0  ;;  %v637_v30 = vmax.bf16 %v621_v22, %v605_v20 }
 0x123   : > { %v544_v26 = vpop.f32.mrb[30].mxu0  ;;  %v638_v27 = vmax.bf16 %v622_v23, %v606_v21 }
 0x124   : > { %v563_v28 = vpack.c.bf16 %v544_v26, %v540_v24  ;;  %v546_v29 = vpop.f32.mrb[31].mxu0 }
 0x125   : > { %v564_v31 = vpack.c.bf16 %v546_v29, %v542_v25  ;;  %849 = vmatprep.mubr.bf16.mxu1 %v638_v27 }
 0x126   : > { %v607_v32 = vadd.bf16 %v1806_v3, %v563_v28  ;;  %850 = vmatmul.mubr.bf16.gmra.mrb[24].mxu1 %v637_v30  ;;  %v1605_v3 = vld [vmem:[%s1930_s5 + $0x28] sm:$0xff]  }
 0x127   : > { %v608_v33 = vadd.bf16 %v1809_v5, %v564_v31  ;;  %1510 = vmatprep.subr.bf16.mxu0 %v1605_v3  ;;  %v1606_v5 = vld [vmem:[%s1930_s5 + $0x30] sm:$0xff]  }
 0x128   : > { %v623_v34 = vmul.bf16 1045249613, %v607_v32  ;;  %1511 = vmatpush3.bf16.msra.mxu0 %v1605_v3 }
 0x129   : > { %v624_v35 = vmul.bf16 1045249613, %v608_v33  ;;  %1512 = vmatprep.subr.bf16.mxu0 %v1606_v5 }
 0x12a   : > { %v639_v37 = vmax.bf16 %v623_v34, %v607_v32 }
 0x12b   : > { %v640_v36 = vmax.bf16 %v624_v35, %v608_v33 }
 0x12c   : > { %1513 = vmatpush3.bf16.msra.mxu0 %v1606_v5 }
 0x12d   : > { %857 = vmatprep.mubr.bf16.mxu1 %v640_v36  ;;  %1514 = vmatprep.subr.bf16.mxu0 %v1607_v40 }
 0x12e   : > { %858 = vmatmul.mubr.bf16.gmra.mrb[28].mxu1 %v639_v37 }
 0x130   : > { %1515 = vmatpush3.bf16.msra.mxu0 %v1607_v40 }
 0x131   : > { %1532 = vmatprep.subr.bf16.mxu0 %v1608_v41 }
 0x1c9   : > { %v1424_v45 = vpop.f32.mrb[0].mxu1 }
 0x1ca   : > { %v1425_v47 = vpop.f32.mrb[1].mxu1 }
 0x1cb   : > { %v1426_v48 = vadd.f32 %v1425_v47, %v1424_v45  ;;  %v1427_v49 = vpop.f32.mrb[2].mxu1 }
 0x1cc   : > { %v1428_v50 = vpop.f32.mrb[3].mxu1 }
 0x1cd   : > { %v1429_v51 = vadd.f32 %v1428_v50, %v1427_v49 }
 0x1cf   : > { %v866_v53 = vpack.c.bf16 %v1429_v51, %v1426_v48 }
 0x1d1   : > { %v883_v54 = vadd.bf16 %v1852_v52, %v866_v53  ;;  %v1430_v55 = vpop.f32.mrb[4].mxu1 }
 0x1d2   : > { %v1431_v57 = vpop.f32.mrb[5].mxu1 }
 0x1d3   : > { %v1432_v58 = vadd.f32 %v1431_v57, %v1430_v55  ;;  %v1433_v59 = vpop.f32.mrb[6].mxu1  ;;  %v891_v60 = vmul.bf16 1045249613, %v883_v54 }
 0x1d4   : > { %v1434_v61 = vpop.f32.mrb[7].mxu1 }
 0x1d5   : > { %v1435_v62 = vadd.f32 %v1434_v61, %v1433_v59  ;;  %v899_v63 = vmax.bf16 %v891_v60, %v883_v54 }
 0x1d7   : > { %v867_v0 = vpack.c.bf16 %v1435_v62, %v1432_v58  ;;  %1516 = vmatprep.mubr.bf16.mxu0 %v899_v63 }
 0x1d9   : > { %v884_v1 = vadd.bf16 %v1852_v52, %v867_v0  ;;  %v1436_v2 = vpop.f32.mrb[8].mxu1 }
 0x1da   : > { %v1437_v4 = vpop.f32.mrb[9].mxu1 }
 0x1db   : > { %v892_v6 = vmul.bf16 1045249613, %v884_v1  ;;  %v1438_v7 = vadd.f32 %v1437_v4, %v1436_v2  ;;  %v1439_v8 = vpop.f32.mrb[10].mxu1  ;;  %v1610_v2 = vld [vmem:[%s1932_s7 + $0x10] sm:$0xff]   ;;  %v1611_v4 = vld [vmem:[%s1932_s7 + $0x18] sm:$0xff]  }
 0x1dc   : > { %v1440_v9 = vpop.f32.mrb[11].mxu1  ;;  %1558 = vmatprep.subr.bf16.mxu1 %v1610_v2 }
 0x1dd   : > { %v900_v10 = vmax.bf16 %v892_v6, %v884_v1  ;;  %v1441_v11 = vadd.f32 %v1440_v9, %v1439_v8  ;;  %1562 = vmatpush3.bf16.msra.mxu1 %v1610_v2 }
 0x1de   : > { %1559 = vmatprep.subr.bf16.mxu1 %v1611_v4 }
 0x1df   : > { %v868_v12 = vpack.c.bf16 %v1441_v11, %v1438_v7  ;;  %1517 = vmatmul.mubr.bf16.vlgmr.msra.gmra.mrb[32].mxu0 %v900_v10 }
 0x1e0   : > { %1533 = vmatpush3.bf16.msra.mxu0 %v1608_v41 }
 0x1e1   : > { %v885_v13 = vadd.bf16 %v1852_v52, %v868_v12  ;;  %v1442_v14 = vpop.f32.mrb[12].mxu1  ;;  %1534 = vmatprep.subr.bf16.mxu0 %v1609_v42  ;;  %1563 = vmatpush3.bf16.msra.mxu1 %v1611_v4 }
 0x1e2   : > { %v1443_v15 = vpop.f32.mrb[13].mxu1 }
 0x1e3   : > { %v1444_v16 = vadd.f32 %v1443_v15, %v1442_v14  ;;  %v1445_v17 = vpop.f32.mrb[14].mxu1  ;;  %v893_v18 = vmul.bf16 1045249613, %v885_v13 }
 0x1e4   : > { %v1446_v19 = vpop.f32.mrb[15].mxu1  ;;  %1535 = vmatpush3.bf16.msra.mxu0 %v1609_v42 }
 0x1e5   : > { %v1447_v20 = vadd.f32 %v1446_v19, %v1445_v17  ;;  %v901_v21 = vmax.bf16 %v893_v18, %v885_v13  ;;  %1536 = vmatprep.subr.bf16.mxu0 %v1610_v2 }
 0x1e7   : > { %v869_v22 = vpack.c.bf16 %v1447_v20, %v1444_v16  ;;  %1520 = vmatprep.mubr.bf16.mxu0 %v901_v21 }
 0x1e8   : > { %1537 = vmatpush3.bf16.msra.mxu0 %v1610_v2 }
 0x1e9   : > { %v886_v23 = vadd.bf16 %v1852_v52, %v869_v22  ;;  %v1448_v24 = vpop.f32.mrb[16].mxu1  ;;  %1538 = vmatprep.subr.bf16.mxu0 %v1611_v4 }
 0x1ea   : > { %v1449_v25 = vpop.f32.mrb[17].mxu1 }
 0x1eb   : > { %v1450_v26 = vadd.f32 %v1449_v25, %v1448_v24  ;;  %v1451_v27 = vpop.f32.mrb[18].mxu1  ;;  %v894_v28 = vmul.bf16 1045249613, %v886_v23 }
 0x1ec   : > { %v1452_v29 = vpop.f32.mrb[19].mxu1  ;;  %1539 = vmatpush3.bf16.msra.mxu0 %v1611_v4 }
 0x1ed   : > { %v1453_v30 = vadd.f32 %v1452_v29, %v1451_v27  ;;  %v902_v31 = vmax.bf16 %v894_v28, %v886_v23 }
 0x1ef   : > { %v870_v32 = vpack.c.bf16 %v1453_v30, %v1450_v26  ;;  %1521 = vmatmul.mubr.bf16.gmra.mrb[36].mxu0 %v902_v31 }
 0x1f1   : > { %v887_v33 = vadd.bf16 %v1852_v52, %v870_v32  ;;  %v1454_v34 = vpop.f32.mrb[20].mxu1 }
 0x1f2   : > { %v1455_v35 = vpop.f32.mrb[21].mxu1 }
 0x1f3   : > { %v1456_v36 = vadd.f32 %v1455_v35, %v1454_v34  ;;  %v1457_v37 = vpop.f32.mrb[22].mxu1  ;;  %v895_v38 = vmul.bf16 1045249613, %v887_v33 }
 0x1f4   : > { %v1458_v39 = vpop.f32.mrb[23].mxu1 }
 0x1f5   : > { %v1459_v3 = vadd.f32 %v1458_v39, %v1457_v37  ;;  %v903_v5 = vmax.bf16 %v895_v38, %v887_v33 }
 0x1f7   : > { %v871_v40 = vpack.c.bf16 %v1459_v3, %v1456_v36  ;;  %1524 = vmatprep.mubr.bf16.mxu0 %v903_v5 }
 0x1f9   : > { %v888_v41 = vadd.bf16 %v1852_v52, %v871_v40  ;;  %v1460_v42 = vpop.f32.mrb[24].mxu1 }
 0x1fa   : > { %v1461_v43 = vpop.f32.mrb[25].mxu1 }
 0x1fb   : > { %v1462_v44 = vadd.f32 %v1461_v43, %v1460_v42  ;;  %v1463_v45 = vpop.f32.mrb[26].mxu1  ;;  %v896_v46 = vmul.bf16 1045249613, %v888_v41 }
 0x1fc   : > { %v1464_v47 = vpop.f32.mrb[27].mxu1 }
 0x1fd   : > { %v1465_v48 = vadd.f32 %v1464_v47, %v1463_v45  ;;  %v904_v49 = vmax.bf16 %v896_v46, %v888_v41 }
 0x1ff   : > { %v872_v50 = vpack.c.bf16 %v1465_v48, %v1462_v44  ;;  %1525 = vmatmul.mubr.bf16.gmra.mrb[40].mxu0 %v904_v49 }
 0x201   : > { %v889_v51 = vadd.bf16 %v1852_v52, %v872_v50  ;;  %v1466_v53 = vpop.f32.mrb[28].mxu1 }
 0x202   : > { %v1467_v54 = vpop.f32.mrb[29].mxu1 }
 0x203   : > { %v1468_v55 = vadd.f32 %v1467_v54, %v1466_v53  ;;  %v1469_v57 = vpop.f32.mrb[30].mxu1  ;;  %v897_v58 = vmul.bf16 1045249613, %v889_v51 }
 0x204   : > { %v1470_v59 = vpop.f32.mrb[31].mxu1 }
 0x205   : > { %v1471_v60 = vadd.f32 %v1470_v59, %v1469_v57  ;;  %v905_v61 = vmax.bf16 %v897_v58, %v889_v51 }
 0x207   : > { %v873_v62 = vpack.c.bf16 %v1471_v60, %v1468_v55  ;;  %1528 = vmatprep.mubr.bf16.mxu0 %v905_v61  ;;  %v1393_v55 = vld [vmem:[%s1933_s8] ss:$0 sm:$0xff] }
 0x209   : > { %v890_v63 = vadd.bf16 %v1852_v52, %v873_v62  ;;  %v1076_v52 = vld [vmem:[%s1931_s6] sm:$0x1] }
 0x20a   : > { %v1077_v6 = vpack.c.bf16 %v1076_v52, %v1076_v52 }
 0x20b   : > { %v898_v0 = vmul.bf16 1045249613, %v890_v63 }
 0x20c   : > { %v1079_v7 = vpack.i.b16 %v1077_v6, %v1077_v6 }
 0x20d   : > { %v906_v1 = vmax.bf16 %v898_v0, %v890_v63 }
 0x20e   : > { %v1084_v10 = vrot.slane %v1079_v7, %v1799_v56 }
 0x20f   : > { %1529 = vmatmul.mubr.bf16.gmra.mrb[44].mxu0 %v906_v1 }
 0x2b2   : > { %v1518_v8 = vpop.f32.mrb[32].mxu0 }
 0x2b3   : > { %v1005_v9 = vpop.f32.mrb[33].mxu0 }
 0x2b4   : > { %v1519_v11 = vpop.f32.mrb[34].mxu0 }
 0x2b5   : > { %v1069_v12 = vpack.c.bf16 %v1519_v11, %v1518_v8  ;;  %v1008_v13 = vpop.f32.mrb[35].mxu0 }
 0x2b6   : > { %v1068_v14 = vpack.c.bf16 %v1008_v13, %v1005_v9 }
 0x2b7   : > { %v1086_v15 = vadd.bf16 %v1084_v10, %v1069_v12 }
 0x2b8   : > { %v1085_v16 = vadd.bf16 %v1084_v10, %v1068_v14 }
 0x2b9   : > { %v1094_v17 = vmul.bf16 1045249613, %v1086_v15 }
 0x2ba   : > { %v1093_v18 = vmul.bf16 1045249613, %v1085_v16 }
 0x2bb   : > { %v1102_v20 = vmax.bf16 %v1094_v17, %v1086_v15 }
 0x2bc   : > { %v1101_v19 = vmax.bf16 %v1093_v18, %v1085_v16 }
 0x2be   : > { %1540 = vmatprep.mubr.msk.bf16.mxu0 %vm1148_vm2, %v1101_v19 }
 0x2bf   : > { %1541 = vmatmul.mubr.msk.bf16.vlgmr.msra.gmra.mrb[48].mxu0 %vm1148_vm2, %v1102_v20 }
 0x2c2   : > { %v1522_v21 = vpop.f32.mrb[36].mxu0 }
 0x2c3   : > { %v1021_v22 = vpop.f32.mrb[37].mxu0 }
 0x2c4   : > { %v1523_v23 = vpop.f32.mrb[38].mxu0 }
 0x2c5   : > { %v1071_v24 = vpack.c.bf16 %v1523_v23, %v1522_v21  ;;  %v1024_v56 = vpop.f32.mrb[39].mxu0 }
 0x2c6   : > { %v1070_v25 = vpack.c.bf16 %v1024_v56, %v1021_v22 }
 0x2c7   : > { %v1088_v26 = vadd.bf16 %v1084_v10, %v1071_v24 }
 0x2c8   : > { %v1087_v27 = vadd.bf16 %v1084_v10, %v1070_v25 }
 0x2c9   : > { %v1096_v28 = vmul.bf16 1045249613, %v1088_v26 }
 0x2ca   : > { %v1095_v29 = vmul.bf16 1045249613, %v1087_v27 }
 0x2cb   : > { %v1104_v31 = vmax.bf16 %v1096_v28, %v1088_v26 }
 0x2cc   : > { %v1103_v30 = vmax.bf16 %v1095_v29, %v1087_v27 }
 0x2ce   : > { %1544 = vmatprep.mubr.msk.bf16.mxu1 %vm1148_vm2, %v1103_v30 }
 0x2cf   : > { %1545 = vmatmul.mubr.msk.bf16.vlgmr.msra.gmra.mrb[32].mxu1 %vm1148_vm2, %v1104_v31 }
 0x2d2   : > { %v1526_v32 = vpop.f32.mrb[40].mxu0 }
 0x2d3   : > { %v1037_v33 = vpop.f32.mrb[41].mxu0 }
 0x2d4   : > { %v1527_v34 = vpop.f32.mrb[42].mxu0 }
 0x2d5   : > { %v1073_v35 = vpack.c.bf16 %v1527_v34, %v1526_v32  ;;  %v1040_v36 = vpop.f32.mrb[43].mxu0 }
 0x2d6   : > { %v1072_v37 = vpack.c.bf16 %v1040_v36, %v1037_v33 }
 0x2d7   : > { %v1090_v38 = vadd.bf16 %v1084_v10, %v1073_v35 }
 0x2d8   : > { %v1089_v39 = vadd.bf16 %v1084_v10, %v1072_v37 }
 0x2d9   : > { %v1098_v3 = vmul.bf16 1045249613, %v1090_v38 }
 0x2da   : > { %v1097_v5 = vmul.bf16 1045249613, %v1089_v39 }
 0x2db   : > { %v1106_v41 = vmax.bf16 %v1098_v3, %v1090_v38 }
 0x2dc   : > { %v1105_v40 = vmax.bf16 %v1097_v5, %v1089_v39 }
 0x2de   : > { %1548 = vmatprep.mubr.msk.bf16.mxu1 %vm1148_vm2, %v1105_v40 }
 0x2df   : > { %1549 = vmatmul.mubr.msk.bf16.gmra.mrb[36].mxu1 %vm1148_vm2, %v1106_v41 }
 0x2e2   : > { %v1530_v42 = vpop.f32.mrb[44].mxu0 }
 0x2e3   : > { %v1053_v43 = vpop.f32.mrb[45].mxu0 }
 0x2e4   : > { %v1531_v44 = vpop.f32.mrb[46].mxu0 }
 0x2e5   : > { %v1075_v45 = vpack.c.bf16 %v1531_v44, %v1530_v42  ;;  %v1056_v46 = vpop.f32.mrb[47].mxu0 }
 0x2e6   : > { %v1074_v47 = vpack.c.bf16 %v1056_v46, %v1053_v43 }
 0x2e7   : > { %v1092_v48 = vadd.bf16 %v1084_v10, %v1075_v45 }
 0x2e8   : > { %v1091_v49 = vadd.bf16 %v1084_v10, %v1074_v47 }
 0x2e9   : > { %v1100_v50 = vmul.bf16 1045249613, %v1092_v48 }
 0x2ea   : > { %v1099_v51 = vmul.bf16 1045249613, %v1091_v49 }
 0x2eb   : > { %v1108_v54 = vmax.bf16 %v1100_v50, %v1092_v48 }
 0x2ec   : > { %v1107_v53 = vmax.bf16 %v1099_v51, %v1091_v49 }
 0x2ee   : > { %1552 = vmatprep.mubr.msk.bf16.mxu1 %vm1148_vm2, %v1107_v53 }
 0x2ef   : > { %1553 = vmatmul.mubr.msk.bf16.gmra.mrb[40].mxu1 %vm1148_vm2, %v1108_v54 }
 0x392   : > { %v1542_v57 = vpop.f32.mrb[48].mxu0 }
 0x393   : > { %v1216_v58 = vadd.f32 %v1542_v57, %v1393_v55  ;;  %v1207_v59 = vpop.f32.mrb[49].mxu0 }
 0x394   : > { %v1208_v60 = vadd.f32 %v1393_v55, %v1207_v59  ;;  %v1543_v61 = vpop.f32.mrb[50].mxu0 }
 0x395   : > { %1273 = vst.msk [vmem:[%s1888_s23 + $0x10] sm:$0xff] %vm1270_vm3, %v1216_v58  ;;  %v1219_v62 = vadd.f32 %v1543_v61, %v1393_v55  ;;  %v1210_v63 = vpop.f32.mrb[51].mxu0 }
 0x396   : > { %1271 = vst.msk [vmem:[%s1888_s23] sm:$0xff] %vm1270_vm3, %v1208_v60  ;;  %v1211_v0 = vadd.f32 %v1393_v55, %v1210_v63 }
 0x397   : > { %1274 = vst.msk [vmem:[%s1888_s23 + $0x18] sm:$0xff] %vm1270_vm3, %v1219_v62 }
 0x398   : > { %1272 = vst.msk [vmem:[%s1888_s23 + $0x8] sm:$0xff] %vm1270_vm3, %v1211_v0 }
 0x3a2   : > { %v1546_v1 = vpop.f32.mrb[32].mxu1 }
 0x3a3   : > { %v1232_v2 = vadd.f32 %v1546_v1, %v1393_v55  ;;  %v1223_v4 = vpop.f32.mrb[33].mxu1 }
 0x3a4   : > { %v1224_v52 = vadd.f32 %v1393_v55, %v1223_v4  ;;  %v1547_v6 = vpop.f32.mrb[34].mxu1 }
 0x3a5   : > { %1277 = vst.msk [vmem:[%s1888_s23 + $0x30] sm:$0xff] %vm1270_vm3, %v1232_v2  ;;  %v1235_v7 = vadd.f32 %v1547_v6, %v1393_v55  ;;  %v1226_v8 = vpop.f32.mrb[35].mxu1 }
 0x3a6   : > { %1275 = vst.msk [vmem:[%s1888_s23 + $0x20] sm:$0xff] %vm1270_vm3, %v1224_v52  ;;  %v1227_v9 = vadd.f32 %v1393_v55, %v1226_v8 }
 0x3a7   : > { %1278 = vst.msk [vmem:[%s1888_s23 + $0x38] sm:$0xff] %vm1270_vm3, %v1235_v7 }
 0x3a8   : > { %1276 = vst.msk [vmem:[%s1888_s23 + $0x28] sm:$0xff] %vm1270_vm3, %v1227_v9 }
 0x3b2   : > { %v1550_v10 = vpop.f32.mrb[36].mxu1 }
 0x3b3   : > { %v1248_v11 = vadd.f32 %v1550_v10, %v1393_v55  ;;  %v1239_v12 = vpop.f32.mrb[37].mxu1 }
 0x3b4   : > { %v1240_v13 = vadd.f32 %v1393_v55, %v1239_v12  ;;  %v1551_v14 = vpop.f32.mrb[38].mxu1 }
 0x3b5   : > { %1281 = vst.msk [vmem:[%s1888_s23 + $0x50] sm:$0xff] %vm1270_vm3, %v1248_v11  ;;  %v1251_v15 = vadd.f32 %v1551_v14, %v1393_v55  ;;  %v1242_v16 = vpop.f32.mrb[39].mxu1 }
 0x3b6   : > { %1279 = vst.msk [vmem:[%s1888_s23 + $0x40] sm:$0xff] %vm1270_vm3, %v1240_v13  ;;  %v1243_v17 = vadd.f32 %v1393_v55, %v1242_v16 }
 0x3b7   : > { %1282 = vst.msk [vmem:[%s1888_s23 + $0x58] sm:$0xff] %vm1270_vm3, %v1251_v15 }
 0x3b8   : > { %1280 = vst.msk [vmem:[%s1888_s23 + $0x48] sm:$0xff] %vm1270_vm3, %v1243_v17 }
 0x3c2   : > { %v1554_v18 = vpop.f32.mrb[40].mxu1 }
 0x3c3   : > { %v1264_v19 = vadd.f32 %v1554_v18, %v1393_v55  ;;  %v1255_v20 = vpop.f32.mrb[41].mxu1 }
 0x3c4   : > { %v1256_v21 = vadd.f32 %v1393_v55, %v1255_v20  ;;  %v1555_v22 = vpop.f32.mrb[42].mxu1 }
 0x3c5   : > { %1285 = vst.msk [vmem:[%s1888_s23 + $0x70] sm:$0xff] %vm1270_vm3, %v1264_v19  ;;  %v1267_v23 = vadd.f32 %v1555_v22, %v1393_v55  ;;  %v1258_v24 = vpop.f32.mrb[43].mxu1 }
 0x3c6   : > { %1283 = vst.msk [vmem:[%s1888_s23 + $0x60] sm:$0xff] %vm1270_vm3, %v1256_v21  ;;  %v1259_v56 = vadd.f32 %v1393_v55, %v1258_v24 }
 0x3c7   : > { %1286 = vst.msk [vmem:[%s1888_s23 + $0x78] sm:$0xff] %vm1270_vm3, %v1267_v23 }
 0x3c8   : > { %1284 = vst.msk [vmem:[%s1888_s23 + $0x68] sm:$0xff] %vm1270_vm3, %v1259_v56 }
 0x3c9 PF: > { %s19_s30 = sadd.s32 1, %s1618_s30  }
 0x3ca   : > { %p16_p4 = scmp.ge.s32.totalorder %s19_s30, 4  }
 0x3cc   :  { %18 = sbr.rel (!%p16_p4) target bundleno = 1 (0x1), region = 86 }

</bundles_post_ra>
